<compile_context>
chip_gen: v7x
topology: tpu7x:2x2x1
jax: 0.10.0
libtpu: 0.0.40
codegen_flags: <defaults>
</compile_context>

<pallas_src>
import functools

import jax
import jax.numpy as jnp
from jax.experimental import pallas as pl
from jax.experimental.pallas import tpu as pltpu

DP = 128  # padded feature width (lanes); must be >= max(in,h1,h2)+1 and >= max(out dims)


def irisnet_kernel(w_ref, x_ref, o_ref):
    """w_ref: (3, DP, DP) packed+bias-folded weights; x_ref/o_ref: (TB, DP)."""
    dp = x_ref.shape[-1]
    x = x_ref[...]  # (TB, DP); column DP-1 holds the constant 1.0 bias input

    # Mask selecting the bias lane (computed once, reused for both hidden layers).
    bias_lane = jax.lax.broadcasted_iota(jnp.int32, x.shape, 1) == (dp - 1)

    # fc1 + ReLU  (bias comes from row DP-1 of w_ref[0] via the ones column of x)
    h = jnp.dot(x, w_ref[0], preferred_element_type=jnp.float32)
    h = jnp.maximum(h, 0.0)
    h = jnp.where(bias_lane, 1.0, h)  # restore the ones column for the next bias

    # fc2 + ReLU
    h = jnp.dot(h, w_ref[1], preferred_element_type=jnp.float32)
    h = jnp.maximum(h, 0.0)
    h = jnp.where(bias_lane, 1.0, h)

    # fc3 (logits, no activation); padded lanes come out as exact zeros.
    o_ref[...] = jnp.dot(h, w_ref[2], preferred_element_type=jnp.float32).astype(o_ref.dtype)


def _round_up(n, m):
    return pl.cdiv(n, m) * m


def _pack_params(w1, b1, w2, b2, w3, b3, dp=DP):
    """Pack (in,out) weights + (1,out) biases into one (3, dp, dp) f32 buffer.

    Layer i occupies rows [0, K_i) / cols [0, N_i); the bias sits in row dp-1.
    Everything else is zero, so padded lanes stay exactly zero through the net.
    """
    def pad_layer(w, b):
        k, n = w.shape
        assert k + 1 <= dp and n <= dp, "layer does not fit in padded width"
        wp = jnp.zeros((dp, dp), jnp.float32)
        wp = wp.at[:k, :n].set(w.astype(jnp.float32))
        wp = wp.at[dp - 1, :n].set(b.reshape(-1).astype(jnp.float32))
        return wp

    return jnp.stack([pad_layer(w1, b1), pad_layer(w2, b2), pad_layer(w3, b3)])


@functools.partial(jax.jit, static_argnames=("max_tile",))
def irisnet_forward(x, w1, b1, w2, b2, w3, b3, *, max_tile=512):
    """x: (B, input_size) f32; w_i: (in, out) f32; b_i: (1, out) f32 -> (B, num_classes)."""
    B, F = x.shape
    C = w3.shape[1]

    params = _pack_params(w1, b1, w2, b2, w3, b3, DP)  # (3, DP, DP), one DMA

    # Batch tiling: TB rows per grid step, padded so TB | Bp.
    TB = min(max_tile, _round_up(B, 8))
    Bp = _round_up(B, TB)

    # Pad x to (Bp, DP) with a constant 1.0 in the bias lane (column DP-1).
    xp = jnp.zeros((Bp, DP), jnp.float32)
    xp = xp.at[:B, :F].set(x.astype(jnp.float32))
    xp = xp.at[:, DP - 1].set(1.0)

    out_pad = pl.pallas_call(
        irisnet_kernel,
        out_shape=jax.ShapeDtypeStruct((Bp, DP), jnp.float32),
        grid=(Bp // TB,),
        in_specs=[
            # Packed weights: single block, constant index -> stays VMEM-resident.
            pl.BlockSpec((3, DP, DP), lambda i: (0, 0, 0)),
            # Activations: pipelined over the batch.
            pl.BlockSpec((TB, DP), lambda i: (i, 0)),
        ],
        out_specs=pl.BlockSpec((TB, DP), lambda i: (i, 0)),
        compiler_params=pltpu.CompilerParams(dimension_semantics=("parallel",)),
    )(params, xp)

    return out_pad[:B, :C]


def irisnet_reference(x, w1, b1, w2, b2, w3, b3):
    h1 = jnp.maximum(x @ w1 + b1, 0.0)
    h2 = jnp.maximum(h1 @ w2 + b2, 0.0)
    return h2 @ w3 + b3


if __name__ == "__main__":
    # IrisNet(input_size=4, hidden1_size=32, hidden2_size=16, num_classes=3)
    input_size, hidden1, hidden2, num_classes = 4, 32, 16, 3
    batch = 8

    key = jax.random.PRNGKey(0)
    kx, k1, k2, k3, kb1, kb2, kb3 = jax.random.split(key, 7)

    x = jax.random.normal(kx, (batch, input_size), dtype=jnp.float32)

    # PyTorch Linear weight is (out, in); we store the transposed (in, out) form.
    w1 = jax.random.normal(k1, (input_size, hidden1), dtype=jnp.float32) * 0.1
    b1 = jax.random.normal(kb1, (1, hidden1), dtype=jnp.float32) * 0.1
    w2 = jax.random.normal(k2, (hidden1, hidden2), dtype=jnp.float32) * 0.1
    b2 = jax.random.normal(kb2, (1, hidden2), dtype=jnp.float32) * 0.1
    w3 = jax.random.normal(k3, (hidden2, num_classes), dtype=jnp.float32) * 0.1
    b3 = jax.random.normal(kb3, (1, num_classes), dtype=jnp.float32) * 0.1

    out = irisnet_forward(x, w1, b1, w2, b2, w3, b3)
    out = jax.block_until_ready(out)

    ref = irisnet_reference(x, w1, b1, w2, b2, w3, b3)
    assert out.shape == (batch, num_classes)
    assert jnp.allclose(out, ref, atol=1e-4, rtol=1e-4)

    print("KERNEL_OK")
</pallas_src>

<mosaic_0001>
module attributes {stable_mosaic.version = 11 : i64} {
  func.func @irisnet_kernel(%arg0: i32, %arg1: memref<3x128x128xf32, #tpu.memory_space<vmem>>, %arg2: memref<8x128xf32, #tpu.memory_space<vmem>>, %arg3: memref<8x128xf32, #tpu.memory_space<vmem>>) attributes {dimension_semantics = [#tpu.dimension_semantics<parallel>], iteration_bounds = array<i64: 1>, scalar_prefetch = 0 : i64, scratch_operands = 0 : i64, tpu.core_type = #tpu.core_type<tc>, window_params = [{pipeline_mode = #tpu.pipeline_mode<synchronous>, transform_indices = @transform_0, window_bounds = array<i64: 3, 128, 128>}, {transform_indices = @transform_1, window_bounds = array<i64: 8, 128>}, {transform_indices = @transform_2, window_bounds = array<i64: 8, 128>}]} {
    %c0 = arith.constant 0 : index
    %c0_0 = arith.constant 0 : index
    %0 = vector.load %arg2[%c0, %c0_0] : memref<8x128xf32, #tpu.memory_space<vmem>>, vector<8x128xf32>
    %1 = tpu.iota {dimensions = array<i32: 1>} : vector<8x128xi32>
    %c127_i32 = arith.constant 127 : i32
    %2 = vector.broadcast %c127_i32 : i32 to vector<8x128xi32>
    %3 = arith.cmpi eq, %1, %2 : vector<8x128xi32>
    %c0_1 = arith.constant 0 : index
    %c0_2 = arith.constant 0 : index
    %c0_3 = arith.constant 0 : index
    %4 = vector.load %arg1[%c0_1, %c0_2, %c0_3] : memref<3x128x128xf32, #tpu.memory_space<vmem>>, vector<1x128x128xf32>
    %5 = vector.shape_cast %4 : vector<1x128x128xf32> to vector<128x128xf32>
    %cst = arith.constant dense<0.000000e+00> : vector<8x128xf32>
    %6 = tpu.matmul %0, %5, %cst {dimension_numbers = #tpu.dot_dimension_numbers<[1], [0], [0], [1], [0, 0, 1, 1], [], []>} : vector<8x128xf32>, vector<128x128xf32>, vector<8x128xf32> -> vector<8x128xf32>
    %cst_4 = arith.constant 0.000000e+00 : f32
    %7 = vector.broadcast %cst_4 : f32 to vector<8x128xf32>
    %8 = arith.maximumf %6, %7 : vector<8x128xf32>
    %cst_5 = arith.constant 1.000000e+00 : f32
    %9 = vector.broadcast %cst_5 : f32 to vector<8x128xf32>
    %10 = arith.select %3, %9, %8 : vector<8x128xi1>, vector<8x128xf32>
    %c1 = arith.constant 1 : index
    %c0_6 = arith.constant 0 : index
    %c0_7 = arith.constant 0 : index
    %11 = vector.load %arg1[%c1, %c0_6, %c0_7] : memref<3x128x128xf32, #tpu.memory_space<vmem>>, vector<1x128x128xf32>
    %12 = vector.shape_cast %11 : vector<1x128x128xf32> to vector<128x128xf32>
    %cst_8 = arith.constant dense<0.000000e+00> : vector<8x128xf32>
    %13 = tpu.matmul %10, %12, %cst_8 {dimension_numbers = #tpu.dot_dimension_numbers<[1], [0], [0], [1], [0, 0, 1, 1], [], []>} : vector<8x128xf32>, vector<128x128xf32>, vector<8x128xf32> -> vector<8x128xf32>
    %cst_9 = arith.constant 0.000000e+00 : f32
    %14 = vector.broadcast %cst_9 : f32 to vector<8x128xf32>
    %15 = arith.maximumf %13, %14 : vector<8x128xf32>
    %cst_10 = arith.constant 1.000000e+00 : f32
    %16 = vector.broadcast %cst_10 : f32 to vector<8x128xf32>
    %17 = arith.select %3, %16, %15 : vector<8x128xi1>, vector<8x128xf32>
    %c2 = arith.constant 2 : index
    %c0_11 = arith.constant 0 : index
    %c0_12 = arith.constant 0 : index
    %18 = vector.load %arg1[%c2, %c0_11, %c0_12] : memref<3x128x128xf32, #tpu.memory_space<vmem>>, vector<1x128x128xf32>
    %19 = vector.shape_cast %18 : vector<1x128x128xf32> to vector<128x128xf32>
    %cst_13 = arith.constant dense<0.000000e+00> : vector<8x128xf32>
    %20 = tpu.matmul %17, %19, %cst_13 {dimension_numbers = #tpu.dot_dimension_numbers<[1], [0], [0], [1], [0, 0, 1, 1], [], []>} : vector<8x128xf32>, vector<128x128xf32>, vector<8x128xf32> -> vector<8x128xf32>
    %c0_14 = arith.constant 0 : index
    %c0_15 = arith.constant 0 : index
    %21 = vector.load %arg3[%c0_14, %c0_15] : memref<8x128xf32, #tpu.memory_space<vmem>>, vector<8x128xf32>
    tpu.vector_store %arg3[%c0_14, %c0_15], %20 {strides = array<i32>} : memref<8x128xf32, #tpu.memory_space<vmem>>, vector<8x128xf32>,
    return
  }
  func.func @transform_0(%arg0: i32) -> (i32, i32, i32) {
    %c0_i32 = arith.constant 0 : i32
    %c0_i32_0 = arith.constant 0 : i32
    %c0_i32_1 = arith.constant 0 : i32
    %c0_i32_2 = arith.constant 0 : i32
    return %c0_i32, %c0_i32_0, %c0_i32_1 : i32, i32, i32
  }
  func.func @transform_1(%arg0: i32) -> (i32, i32) {
    %c0_i32 = arith.constant 0 : i32
    %c0_i32_0 = arith.constant 0 : i32
    return %arg0, %c0_i32 : i32, i32
  }
  func.func @transform_2(%arg0: i32) -> (i32, i32) {
    %c0_i32 = arith.constant 0 : i32
    %c0_i32_0 = arith.constant 0 : i32
    return %arg0, %c0_i32 : i32, i32
  }
}

</mosaic_0001>

<bundles_post_ra>
// kernel: irisnet_forward.1
= control target key start
LH: loop header
LB: loop body
LE: loop exit
PB: predicated region body
PF: predicated region fallthrough
CT: control target
= control target key end

     0   :  { %v547_v0 = vmov 0.0|0.0   ;;  %vm548_vm0 = vmmov 0   ;;  %v549_v4 = vmov 0.0   ;;  %s745_s0 = inlined_call_operand.vmem [shape: f32[3,128,128], index: 0, kind: input, shape index: {}]   ;;  %s746_s1 = inlined_call_operand.vmem [shape: f32[8,128], index: 1, kind: input, shape index: {}]   ;;  %s747_s2 = inlined_call_operand.vmem [shape: f32[8,128], index: 2, kind: output, shape index: {}]  }
   0x1   :  { %472 = vmatprep.subr.bf16.mxu0 %v547_v0  ;;  %v15_v1 = vld [vmem:[%s745_s0] sm:$0xff]  ;;  %v16_v2 = vld [vmem:[%s745_s0 + $0x8] sm:$0xff]  ;;  %v17_v3 = vld [vmem:[%s745_s0 + $0x10] sm:$0xff]  ;;  %399 = vmatprep.mubr.msk.f32.mxu0 %vm548_vm0, %v549_v4 }
   0x2   :  { %v473_v5 = vpack.c.bf16 %v16_v2, %v15_v1  ;;  %v18_v6 = vld [vmem:[%s745_s0 + $0x18] sm:$0xff]  ;;  %496 = vmatprep.subr.bf16.mxu1 %v547_v0  ;;  %434 = vmatprep.mubr.msk.f32.mxu1 %vm548_vm0, %v549_v4  ;;  %v19_v8 = vld [vmem:[%s745_s0 + $0x20] sm:$0xff]  ;;  %v20_v9 = vld [vmem:[%s745_s0 + $0x28] sm:$0xff] }
   0x3   :  { %v476_v7 = vpack.c.bf16 %v18_v6, %v17_v3  ;;  %v284_v10 = vld [vmem:[%s745_s0 + $0x80] sm:$0xff]  ;;  %v285_v11 = vld [vmem:[%s745_s0 + $0x88] sm:$0xff]  ;;  %v286_v12 = vld [vmem:[%s745_s0 + $0x90] sm:$0xff]  ;;  %v479_v14 = vpack.c.bf16 %v20_v9, %v19_v8  ;;  %v12_v9 = vlaneseq }
   0x4   :  { %474 = vmatpush3.bf16.msra.mxu0 %v473_v5  ;;  %v287_v13 = vld [vmem:[%s745_s0 + $0x98] sm:$0xff]  ;;  %v497_v15 = vpack.c.bf16 %v285_v11, %v284_v10  ;;  %v21_v16 = vld [vmem:[%s745_s0 + $0x30] sm:$0xff]  ;;  %v288_v19 = vld [vmem:[%s745_s0 + $0xa0] sm:$0xff] }
   0x5   :  { %475 = vmatprep.subr.bf16.mxu0 %v547_v0  ;;  %v22_v17 = vld [vmem:[%s745_s0 + $0x38] sm:$0xff]  ;;  %v500_v18 = vpack.c.bf16 %v287_v13, %v286_v12  ;;  %v289_v20 = vld [vmem:[%s745_s0 + $0xa8] sm:$0xff]  ;;  %v23_v22 = vld [vmem:[%s745_s0 + $0x40] sm:$0xff]  ;;  %v13_v10 = vand.u32 127, %v12_v9 }
   0x6   :  { %498 = vmatpush3.bf16.msra.mxu1 %v497_v15  ;;  %v482_v21 = vpack.c.bf16 %v22_v17, %v21_v16  ;;  %v24_v23 = vld [vmem:[%s745_s0 + $0x48] sm:$0xff]  ;;  %v503_v24 = vpack.c.bf16 %v289_v20, %v288_v19  ;;  %v290_v25 = vld [vmem:[%s745_s0 + $0xb0] sm:$0xff]  ;;  %v291_v26 = vld [vmem:[%s745_s0 + $0xb8] sm:$0xff] }
   0x7   :  { %499 = vmatprep.subr.bf16.mxu1 %v547_v0  ;;  %v485_v27 = vpack.c.bf16 %v24_v23, %v23_v22  ;;  %v25_v28 = vld [vmem:[%s745_s0 + $0x50] sm:$0xff]  ;;  %v26_v29 = vld [vmem:[%s745_s0 + $0x58] sm:$0xff]  ;;  %v506_v30 = vpack.c.bf16 %v291_v26, %v290_v25  ;;  %v292_v31 = vld [vmem:[%s745_s0 + $0xc0] sm:$0xff]  ;;  %vm14_vm1 = vcmp.eq.s32.totalorder %v13_v10, 127 }
   0x8   :  { %477 = vmatpush3.bf16.msra.mxu0 %v476_v7  ;;  %v293_v32 = vld [vmem:[%s745_s0 + $0xc8] sm:$0xff]  ;;  %v488_v33 = vpack.c.bf16 %v26_v29, %v25_v28  ;;  %v27_v34 = vld [vmem:[%s745_s0 + $0x60] sm:$0xff]  ;;  %v294_v37 = vld [vmem:[%s745_s0 + $0xd0] sm:$0xff] }
   0x9   :  { %478 = vmatprep.subr.bf16.mxu0 %v547_v0  ;;  %v28_v35 = vld [vmem:[%s745_s0 + $0x68] sm:$0xff]  ;;  %v509_v36 = vpack.c.bf16 %v293_v32, %v292_v31  ;;  %v295_v38 = vld [vmem:[%s745_s0 + $0xd8] sm:$0xff]  ;;  %v29_v40 = vld [vmem:[%s745_s0 + $0x70] sm:$0xff] }
   0xa   :  { %501 = vmatpush3.bf16.msra.mxu1 %v500_v18  ;;  %v491_v39 = vpack.c.bf16 %v28_v35, %v27_v34  ;;  %v30_v41 = vld [vmem:[%s745_s0 + $0x78] sm:$0xff]  ;;  %v512_v42 = vpack.c.bf16 %v295_v38, %v294_v37  ;;  %v296_v43 = vld [vmem:[%s745_s0 + $0xe0] sm:$0xff]  ;;  %v297_v44 = vld [vmem:[%s745_s0 + $0xe8] sm:$0xff] }
   0xb   :  { %502 = vmatprep.subr.bf16.mxu1 %v547_v0  ;;  %v494_v45 = vpack.c.bf16 %v30_v41, %v29_v40  ;;  %v515_v46 = vpack.c.bf16 %v297_v44, %v296_v43  ;;  %v11_v47 = vld [vmem:[%s746_s1] sm:$0xff]  ;;  %v298_v48 = vld [vmem:[%s745_s0 + $0xf0] sm:$0xff]  ;;  %v299_v49 = vld [vmem:[%s745_s0 + $0xf8] sm:$0xff] }
   0xc   :  { %480 = vmatpush3.bf16.msra.mxu0 %v479_v14  ;;  %v518_v50 = vpack.c.bf16 %v299_v49, %v298_v48  ;;  %v300_v51 = vld [vmem:[%s745_s0 + $0x100] sm:$0xff]  ;;  %v301_v52 = vld [vmem:[%s745_s0 + $0x108] sm:$0xff]  ;;  %v302_v53 = vld [vmem:[%s745_s0 + $0x110] sm:$0xff] }
   0xd   :  { %481 = vmatprep.subr.bf16.mxu0 %v547_v0  ;;  %v521_v54 = vpack.c.bf16 %v301_v52, %v300_v51  ;;  %v303_v55 = vld [vmem:[%s745_s0 + $0x118] sm:$0xff]  ;;  %v304_v57 = vld [vmem:[%s745_s0 + $0x120] sm:$0xff]  ;;  %v305_v58 = vld [vmem:[%s745_s0 + $0x128] sm:$0xff] }
   0xe   :  { %504 = vmatpush3.bf16.msra.mxu1 %v503_v24  ;;  %v524_v56 = vpack.c.bf16 %v303_v55, %v302_v53  ;;  %v527_v59 = vpack.c.bf16 %v305_v58, %v304_v57  ;;  %v306_v60 = vld [vmem:[%s745_s0 + $0x130] sm:$0xff]  ;;  %v307_v61 = vld [vmem:[%s745_s0 + $0x138] sm:$0xff]  ;;  %v308_v63 = vld [vmem:[%s745_s0 + $0x140] sm:$0xff] }
   0xf   :  { %505 = vmatprep.subr.bf16.mxu1 %v547_v0  ;;  %v530_v62 = vpack.c.bf16 %v307_v61, %v306_v60  ;;  %v309_v1 = vld [vmem:[%s745_s0 + $0x148] sm:$0xff]  ;;  %v310_v3 = vld [vmem:[%s745_s0 + $0x150] sm:$0xff]  ;;  %v312_v6 = vld [vmem:[%s745_s0 + $0x160] sm:$0xff] }
  0x10   :  { %483 = vmatpush3.bf16.msra.mxu0 %v482_v21  ;;  %v533_v2 = vpack.c.bf16 %v309_v1, %v308_v63  ;;  %v313_v7 = vld [vmem:[%s745_s0 + $0x168] sm:$0xff]  ;;  %v314_v15 = vld [vmem:[%s745_s0 + $0x170] sm:$0xff]  ;;  %v315_v16 = vld [vmem:[%s745_s0 + $0x178] sm:$0xff] }
  0x11   :  { %484 = vmatprep.subr.bf16.mxu0 %v547_v0  ;;  %v539_v8 = vpack.c.bf16 %v313_v7, %v312_v6  ;;  %v542_v17 = vpack.c.bf16 %v315_v16, %v314_v15 }
  0x12   :  { %507 = vmatpush3.bf16.msra.mxu1 %v506_v30 }
  0x13   :  { %508 = vmatprep.subr.bf16.mxu1 %v547_v0 }
  0x14   :  { %486 = vmatpush3.bf16.msra.mxu0 %v485_v27 }
  0x15   :  { %487 = vmatprep.subr.bf16.mxu0 %v547_v0 }
  0x16   :  { %510 = vmatpush3.bf16.msra.mxu1 %v509_v36 }
  0x17   :  { %511 = vmatprep.subr.bf16.mxu1 %v547_v0 }
  0x18   :  { %489 = vmatpush3.bf16.msra.mxu0 %v488_v33 }
  0x19   :  { %490 = vmatprep.subr.bf16.mxu0 %v547_v0 }
  0x1a   :  { %513 = vmatpush3.bf16.msra.mxu1 %v512_v42 }
  0x1b   :  { %514 = vmatprep.subr.bf16.mxu1 %v547_v0 }
  0x1c   :  { %492 = vmatpush3.bf16.msra.mxu0 %v491_v39 }
  0x1d   :  { %493 = vmatprep.subr.bf16.mxu0 %v547_v0 }
  0x1e   :  { %516 = vmatpush3.bf16.msra.mxu1 %v515_v46 }
  0x1f   :  { %517 = vmatprep.subr.bf16.mxu1 %v547_v0 }
  0x20   :  { %495 = vmatpush3.bf16.msra.mxu0 %v494_v45 }
  0x21   :  { %520 = vmatprep.subr.bf16.mxu0 %v547_v0 }
  0x22   :  { %519 = vmatpush3.bf16.msra.mxu1 %v518_v50 }
  0x23   :  { %400 = vmatmul.mubr.f32.vlgmr.msra.gmra.mrb[0].mxu0 %v11_v47 }
  0x24   :  { %469 = vmatprep.mubr.msk.f32.mxu0 %vm548_vm0, %v549_v4  ;;  %522 = vmatpush3.bf16.msra.mxu0 %v521_v54  ;;  %v311_v4 = vld [vmem:[%s745_s0 + $0x158] sm:$0xff] }
  0x25   :  { %523 = vmatprep.subr.bf16.mxu0 %v547_v0  ;;  %v536_v5 = vpack.c.bf16 %v311_v4, %v310_v3 }
  0x28   :  { %525 = vmatpush3.bf16.msra.mxu0 %v524_v56 }
  0x29   :  { %526 = vmatprep.subr.bf16.mxu0 %v547_v0 }
  0x2c   :  { %528 = vmatpush3.bf16.msra.mxu0 %v527_v59 }
  0x2d   :  { %529 = vmatprep.subr.bf16.mxu0 %v547_v0 }
  0x30   :  { %531 = vmatpush3.bf16.msra.mxu0 %v530_v62 }
  0x31   :  { %532 = vmatprep.subr.bf16.mxu0 %v547_v0 }
  0x34   :  { %534 = vmatpush3.bf16.msra.mxu0 %v533_v2 }
  0x35   :  { %535 = vmatprep.subr.bf16.mxu0 %v547_v0 }
  0x38   :  { %537 = vmatpush3.bf16.msra.mxu0 %v536_v5 }
  0x39   :  { %538 = vmatprep.subr.bf16.mxu0 %v547_v0 }
  0x3c   :  { %540 = vmatpush3.bf16.msra.mxu0 %v539_v8 }
  0x3d   :  { %541 = vmatprep.subr.bf16.mxu0 %v547_v0 }
  0x40   :  { %543 = vmatpush3.bf16.msra.mxu0 %v542_v17 }
  0xf6   :  { %v97_v11 = vpop.f32.mrb[0].mxu0 }
  0xf7   :  { %v101_v12 = vmax.f32 %v97_v11, 0.0  ;;  %v401_v13 = vpop.f32.mrb[1].mxu0 }
  0xf9   :  { %v102_v14 = vsel %vm14_vm1, 1.0, %v101_v12 }
  0xfa   :  { %435 = vmatmul.mubr.f32.vlgmr.msra.gmra.mrb[0].mxu1 %v102_v14 }
 0x1cd   :  { %v186_v18 = vpop.f32.mrb[0].mxu1 }
 0x1ce   :  { %v190_v0 = vmax.f32 %v186_v18, 0.0  ;;  %v436_v19 = vpop.f32.mrb[1].mxu1 }
 0x1d0   :  { %v191_v20 = vsel %vm14_vm1, 1.0, %v190_v0 }
 0x1d1   :  { %470 = vmatmul.mubr.f32.vlgmr.msra.gmra.mrb[2].mxu0 %v191_v20 }
 0x2a4   :  { %v275_v21 = vpop.f32.mrb[2].mxu0 }
 0x2a5   :  { %279 = vst [vmem:[%s747_s2] sm:$0xff] %v275_v21  ;;  %v471_v22 = vpop.f32.mrb[3].mxu0 }

</bundles_post_ra>
